<compile_context>
chip_gen: v7x
topology: tpu7x:2x2x1
jax: 0.10.0
libtpu: 0.0.40
codegen_flags: <defaults>
</compile_context>

<pallas_src>
import jax
import jax.numpy as jnp
from jax.experimental import pallas as pl
from jax.experimental.pallas import tpu as pltpu


def _copy_kernel(x_ref, o_ref):
    # Identity copy of one lane-dense (block_rows, lane) tile resident in VMEM.
    o_ref[...] = x_ref[...]


def _pick_tiling(total, itemsize):
    """Pick a lane-dense tiling of a flat extent of `total` elements."""
    # Lane (last-dim) width: big multiple of 128 for unmasked stores; shrink
    # for tiny inputs so padding overhead stays negligible.
    lane = 1024
    while lane > 128 and total < 8 * lane:
        lane //= 2
    rows = pl.cdiv(total, lane)
    # Sublane block: multiple of 8, capped so one block is <= ~2 MiB.
    # Double-buffered in + out => <= ~8 MiB VMEM.
    max_rows = max(8, (2 * 1024 * 1024) // (lane * itemsize))
    max_rows = (max_rows // 8) * 8
    block_rows = min(max_rows, ((rows + 7) // 8) * 8)
    rows_pad = pl.cdiv(rows, block_rows) * block_rows
    return lane, block_rows, rows_pad


def _flatten_impl(x):
    """Equivalent of FlattenLayer.forward: x.view(x.shape[0], -1)."""
    b = x.shape[0]
    n = 1
    for d in x.shape[1:]:
        n *= d
    total = b * n

    itemsize = jnp.dtype(x.dtype).itemsize
    lane, block_rows, rows_pad = _pick_tiling(total, itemsize)
    padded = rows_pad * lane

    # Layout plumbing (free for a contiguous array): collapse to 1-D, pad to a
    # whole number of lane-dense tiles, present as (rows_pad, lane).
    flat = jnp.reshape(x, (total,))
    if padded != total:
        flat = jnp.pad(flat, (0, padded - total))
    x2d = jnp.reshape(flat, (rows_pad, lane))

    grid = (rows_pad // block_rows,)
    out2d = pl.pallas_call(
        _copy_kernel,
        out_shape=jax.ShapeDtypeStruct((rows_pad, lane), x.dtype),
        grid_spec=pltpu.PrefetchScalarGridSpec(
            num_scalar_prefetch=0,
            grid=grid,
            in_specs=[pl.BlockSpec((block_rows, lane), lambda i: (i, 0))],
            out_specs=pl.BlockSpec((block_rows, lane), lambda i: (i, 0)),
        ),
        compiler_params=pltpu.CompilerParams(
            dimension_semantics=("parallel",),
        ),
        cost_estimate=pl.CostEstimate(
            flops=0,
            transcendentals=0,
            bytes_accessed=2 * padded * itemsize,
        ),
    )(x2d)

    # Undo the tiling/padding (metadata-only reshape + cheap slice if padded).
    out_flat = jnp.reshape(out2d, (padded,))
    if padded != total:
        out_flat = out_flat[:total]
    return jnp.reshape(out_flat, (b, n))


flatten_layer = jax.jit(_flatten_impl)


if __name__ == "__main__":
    key = jax.random.PRNGKey(0)

    # NCHW input, small shapes: batch=2, channels=4, spatial=16x16.
    x = jax.random.normal(key, (2, 4, 16, 16), dtype=jnp.float32)
    y = jax.block_until_ready(flatten_layer(x))
    ref = jnp.reshape(x, (x.shape[0], -1))
    assert y.shape == (2, 4 * 16 * 16)
    assert y.dtype == x.dtype
    assert bool(jnp.array_equal(y, ref))

    # Also exercise the padded (non-tile-multiple) path.
    x2 = jax.random.normal(jax.random.PRNGKey(1), (2, 3, 5, 7), dtype=jnp.float32)
    y2 = jax.block_until_ready(flatten_layer(x2))
    ref2 = jnp.reshape(x2, (x2.shape[0], -1))
    assert y2.shape == ref2.shape
    assert bool(jnp.array_equal(y2, ref2))

    print("KERNEL_OK")
</pallas_src>

<mosaic_0001>
module attributes {stable_mosaic.version = 11 : i64} {
  func.func @_copy_kernel(%arg0: i32, %arg1: memref<8x256xf32, #tpu.memory_space<vmem>>, %arg2: memref<8x256xf32, #tpu.memory_space<vmem>>) attributes {dimension_semantics = [#tpu.dimension_semantics<parallel>], iteration_bounds = array<i64: 1>, scalar_prefetch = 0 : i64, scratch_operands = 0 : i64, tpu.core_type = #tpu.core_type<tc>, window_params = [{transform_indices = @transform_0, window_bounds = array<i64: 8, 256>}, {transform_indices = @transform_1, window_bounds = array<i64: 8, 256>}]} {
    %c0 = arith.constant 0 : index
    %c0_0 = arith.constant 0 : index
    %0 = vector.load %arg1[%c0, %c0_0] : memref<8x256xf32, #tpu.memory_space<vmem>>, vector<8x256xf32>
    %c0_1 = arith.constant 0 : index
    %c0_2 = arith.constant 0 : index
    %1 = vector.load %arg2[%c0_1, %c0_2] : memref<8x256xf32, #tpu.memory_space<vmem>>, vector<8x256xf32>
    tpu.vector_store %arg2[%c0_1, %c0_2], %0 {strides = array<i32>} : memref<8x256xf32, #tpu.memory_space<vmem>>, vector<8x256xf32>,
    return
  }
  func.func @transform_0(%arg0: i32) -> (i32, i32) {
    %c0_i32 = arith.constant 0 : i32
    %c0_i32_0 = arith.constant 0 : i32
    return %arg0, %c0_i32 : i32, i32
  }
  func.func @transform_1(%arg0: i32) -> (i32, i32) {
    %c0_i32 = arith.constant 0 : i32
    %c0_i32_0 = arith.constant 0 : i32
    return %arg0, %c0_i32 : i32, i32
  }
}

</mosaic_0001>

<bundles_post_ra>
// kernel: _flatten_impl.1
= control target key start
LH: loop header
LB: loop body
LE: loop exit
PB: predicated region body
PF: predicated region fallthrough
CT: control target
= control target key end

     0   :  { %s38_s0 = inlined_call_operand.vmem [shape: f32[8,256], index: 0, kind: input, shape index: {}]   ;;  %s39_s1 = inlined_call_operand.vmem [shape: f32[8,256], index: 1, kind: output, shape index: {}]  }
   0x1   :  { %v8_v0 = vld [vmem:[%s38_s0] sm:$0xff]  ;;  %v9_v1 = vld [vmem:[%s38_s0 + $0x8] sm:$0xff] }
   0x2   :  { %10 = vst [vmem:[%s39_s1] sm:$0xff] %v8_v0  ;;  %11 = vst [vmem:[%s39_s1 + $0x8] sm:$0xff] %v9_v1 }

</bundles_post_ra>
